<compile_context>
chip_gen: v5e
topology: v5e:2x2
jax: 0.10.0
libtpu: 0.0.40
codegen_flags: <defaults>
</compile_context>

<pallas_src>
import functools

import jax
import jax.numpy as jnp
from jax.experimental import pallas as pl
from jax.experimental.pallas import tpu as pltpu

_ROW_TILE = 1024                       # max rows per grid step (multiple of 8)
_MAX_IN_BLOCK_BYTES = 8 * 1024 * 1024  # cap on the input block size


def _round_up(x: int, m: int) -> int:
    return ((x + m - 1) // m) * m


def _bam_kernel(x_ref, o_ref, *, gamma: float, num_channels: int):
    # x_ref: (C, tr, L) VMEM tile; o_ref: (tr, L) VMEM tile.
    # Static per-channel unroll -> plain VPU vmaximum, one live slab at a time.
    v = x_ref[0]
    for c in range(1, num_channels):
        v = jnp.maximum(v, x_ref[c])
    # Compute in f32 regardless of input dtype; matches torch.pow(1 - v, gamma)
    # (no clamp: negative base -> NaN just like the reference).
    base = jnp.float32(1.0) - v.astype(jnp.float32)
    if gamma == 2.5:
        # (1-v)^2.5 == (1-v)^2 * sqrt(1-v): 2 VPU muls + 1 EUP sqrt.
        bam = base * base * jnp.sqrt(base)
    else:
        bam = jnp.power(base, jnp.float32(gamma))
    o_ref[...] = bam.astype(o_ref.dtype)


def brightness_attention_map(image: jax.Array, gamma: float = 2.5) -> jax.Array:
    """image: [B, C, H, W] float in [0, 1]. Returns [B, 1, H, W]."""
    # TODO(synk): denoise_ksize (median blur) path not implemented; module default is None.
    B, C, H, W = image.shape
    N = H * W

    # Prefer a lane-dense flattened layout (free metadata reshape, no pad).
    lane = None
    for cand in (512, 256, 128):
        if N % cand == 0:
            lane = cand
            break

    if lane is not None:
        R, L = N // lane, lane
        x = image.reshape(B, C, R, L)
    else:
        # Rare odd sizes: tile the original layout directly. Last dim = full W
        # (masked stores only on this path, but zero extra HBM traffic).
        R, L = H, W
        x = image

    itemsize = jnp.dtype(image.dtype).itemsize
    # Row tile: multiple of 8, input block capped so double-buffered in-flight
    # VMEM stays well under the 32 MiB scoped limit on every chip generation.
    tr_cap = max(8, (_MAX_IN_BLOCK_BYTES // (C * L * itemsize)) // 8 * 8)
    tile_limit = min(_ROW_TILE, tr_cap)
    if R <= tile_limit:
        tr = R                                   # single full-extent row block...
        if B == 1 and R >= 16:
            tr = _round_up(-(-R // 2), 8)        # ...split in 2 so both v7x TCs stream
    else:
        tr = tile_limit

    grid = (B, pl.cdiv(R, tr))                   # ragged last block handled by Pallas

    kernel = functools.partial(_bam_kernel, gamma=float(gamma), num_channels=C)
    out = pl.pallas_call(
        kernel,
        out_shape=jax.ShapeDtypeStruct((B, 1, R, L), image.dtype),
        grid_spec=pltpu.PrefetchScalarGridSpec(
            num_scalar_prefetch=0,
            grid=grid,
            in_specs=[
                pl.BlockSpec((pl.Squeezed(), C, tr, L), lambda b, r: (b, 0, r, 0)),
            ],
            out_specs=pl.BlockSpec(
                (pl.Squeezed(), pl.Squeezed(), tr, L), lambda b, r: (b, 0, r, 0)
            ),
        ),
        compiler_params=pltpu.CompilerParams(
            dimension_semantics=("parallel", "parallel"),
            vmem_limit_bytes=32 * 1024 * 1024,   # explicit headroom on v5e/v7x defaults
        ),
    )(x)

    return out.reshape(B, 1, H, W)


def _reference_bam(image: jax.Array, gamma: float = 2.5) -> jax.Array:
    v = jnp.max(image, axis=1, keepdims=True)
    return jnp.power(1.0 - v, gamma)


if __name__ == "__main__":
    key = jax.random.PRNGKey(0)

    # 1) Lane-dense path (N divisible by 128), default gamma, B > 1.
    B, C, H, W = 2, 3, 16, 16
    x = jax.random.uniform(key, (B, C, H, W), dtype=jnp.float32)
    out = jax.block_until_ready(brightness_attention_map(x, gamma=2.5))
    ref = _reference_bam(x, gamma=2.5)
    assert out.shape == (B, 1, H, W), out.shape
    assert jnp.allclose(out, ref, atol=1e-5, rtol=1e-5), float(jnp.max(jnp.abs(out - ref)))

    # 2) Odd spatial size (N not a multiple of 128): direct 4-D tiling path,
    #    B == 1 megacore row-split, ragged last block, generic-gamma branch.
    x2 = jax.random.uniform(jax.random.PRNGKey(0), (1, 3, 20, 24), dtype=jnp.float32)
    out2 = jax.block_until_ready(brightness_attention_map(x2, gamma=1.8))
    ref2 = _reference_bam(x2, gamma=1.8)
    assert out2.shape == (1, 1, 20, 24), out2.shape
    assert jnp.allclose(out2, ref2, atol=1e-5, rtol=1e-5), float(jnp.max(jnp.abs(out2 - ref2)))

    # 3) Lane-dense path with B == 1, small R (no split), fast gamma branch.
    x3 = jax.random.uniform(jax.random.PRNGKey(1), (1, 3, 32, 32), dtype=jnp.float32)
    out3 = jax.block_until_ready(brightness_attention_map(x3, gamma=2.5))
    ref3 = _reference_bam(x3, gamma=2.5)
    assert out3.shape == (1, 1, 32, 32), out3.shape
    assert jnp.allclose(out3, ref3, atol=1e-5, rtol=1e-5), float(jnp.max(jnp.abs(out3 - ref3)))

    print("KERNEL_OK")
</pallas_src>

<mosaic_0001>
module attributes {stable_mosaic.version = 11 : i64} {
  func.func @_bam_kernel(%arg0: i32, %arg1: i32, %arg2: memref<1x3x1x256xf32, #tpu.memory_space<vmem>>, %arg3: memref<1x1x1x256xf32, #tpu.memory_space<vmem>>) attributes {dimension_semantics = [#tpu.dimension_semantics<parallel>, #tpu.dimension_semantics<parallel>], iteration_bounds = array<i64: 2, 1>, scalar_prefetch = 0 : i64, scratch_operands = 0 : i64, tpu.core_type = #tpu.core_type<tc>, window_params = [{transform_indices = @transform_0, window_bounds = array<i64: 1, 3, 1, 256>}, {transform_indices = @transform_1, window_bounds = array<i64: 1, 1, 1, 256>}]} {
    %c0 = arith.constant 0 : index
    %c0_0 = arith.constant 0 : index
    %c0_1 = arith.constant 0 : index
    %c0_2 = arith.constant 0 : index
    %0 = vector.load %arg2[%c0, %c0_0, %c0_1, %c0_2] : memref<1x3x1x256xf32, #tpu.memory_space<vmem>>, vector<1x1x1x256xf32>
    %1 = vector.shape_cast %0 : vector<1x1x1x256xf32> to vector<1x256xf32>
    %c0_3 = arith.constant 0 : index
    %c1 = arith.constant 1 : index
    %c0_4 = arith.constant 0 : index
    %c0_5 = arith.constant 0 : index
    %2 = vector.load %arg2[%c0_3, %c1, %c0_4, %c0_5] : memref<1x3x1x256xf32, #tpu.memory_space<vmem>>, vector<1x1x1x256xf32>
    %3 = vector.shape_cast %2 : vector<1x1x1x256xf32> to vector<1x256xf32>
    %4 = arith.maximumf %1, %3 : vector<1x256xf32>
    %c0_6 = arith.constant 0 : index
    %c2 = arith.constant 2 : index
    %c0_7 = arith.constant 0 : index
    %c0_8 = arith.constant 0 : index
    %5 = vector.load %arg2[%c0_6, %c2, %c0_7, %c0_8] : memref<1x3x1x256xf32, #tpu.memory_space<vmem>>, vector<1x1x1x256xf32>
    %6 = vector.shape_cast %5 : vector<1x1x1x256xf32> to vector<1x256xf32>
    %7 = arith.maximumf %4, %6 : vector<1x256xf32>
    %cst = arith.constant 1.000000e+00 : f32
    %8 = vector.broadcast %cst : f32 to vector<1x256xf32>
    %9 = arith.subf %8, %7 : vector<1x256xf32>
    %10 = arith.mulf %9, %9 : vector<1x256xf32>
    %11 = math.sqrt %9 : vector<1x256xf32>
    %12 = arith.mulf %10, %11 : vector<1x256xf32>
    %c0_9 = arith.constant 0 : index
    %c0_10 = arith.constant 0 : index
    %c0_11 = arith.constant 0 : index
    %c0_12 = arith.constant 0 : index
    %13 = vector.load %arg3[%c0_9, %c0_10, %c0_11, %c0_12] : memref<1x1x1x256xf32, #tpu.memory_space<vmem>>, vector<1x1x1x256xf32>
    %14 = vector.shape_cast %13 : vector<1x1x1x256xf32> to vector<1x256xf32>
    %15 = vector.shape_cast %12 : vector<1x256xf32> to vector<1x1x1x256xf32>
    tpu.vector_store %arg3[%c0_9, %c0_10, %c0_11, %c0_12], %15 {strides = array<i32>} : memref<1x1x1x256xf32, #tpu.memory_space<vmem>>, vector<1x1x1x256xf32>,
    return
  }
  func.func @transform_0(%arg0: i32, %arg1: i32) -> (i32, i32, i32, i32) {
    %c0_i32 = arith.constant 0 : i32
    %c0_i32_0 = arith.constant 0 : i32
    %c0_i32_1 = arith.constant 0 : i32
    return %arg0, %c0_i32, %arg1, %c0_i32_0 : i32, i32, i32, i32
  }
  func.func @transform_1(%arg0: i32, %arg1: i32) -> (i32, i32, i32, i32) {
    %c0_i32 = arith.constant 0 : i32
    %c0_i32_0 = arith.constant 0 : i32
    %c0_i32_1 = arith.constant 0 : i32
    return %arg0, %c0_i32, %arg1, %c0_i32_0 : i32, i32, i32, i32
  }
}

</mosaic_0001>

<bundles_post_ra>
// kernel: tpu_custom_call.1
= control target key start
LH: loop header
LB: loop body
LE: loop exit
PB: predicated region body
PF: predicated region fallthrough
CT: control target
= control target key end

     0   :  { %6 = vsyncpa [#allocation3], 0  ;;  %s609_s0 = inlined_call_operand.hbm [shape: f32[2,3,1,256], index: 0, kind: input, shape index: {}]   ;;  %s610_s1 = inlined_call_operand.hbm [shape: f32[2,1,1,256], index: 1, kind: output, shape index: {}]  }
   0x1   :  { %8 = vsyncpa [#allocation3 + $0x1], 0 }
   0x2   :  { %9 = vsyncpa [#allocation4], 0 }
   0x3   :  { %11 = vsyncpa [#allocation4 + $0x1], 0  ;;  %s488_s6 = smov 0   ;;  %s490_s7 = smov 0  }
   0x4   :  { %s492_s8 = smov 0   ;;  %s494_s9 = smov 0  }
   0x5   :  { %s496_s10 = smov 0   ;;  %s498_s11 = smov 0  }
   0x6 LB: > { %s281_s12 = sadd.s32 4294967295, %s474_s11   ;;  %s282_s13 = sadd.s32 4294967294, %s474_s11   ;;  %s474_s11 = sphi %s498_s11, %s17_s11   ;;  %s470_s10 = sphi %s496_s10, %s619_s10   ;;  %s466_s9 = sphi %s494_s9, %s618_s9   ;;  %s462_s8 = sphi %s492_s8, %s617_s8   ;;  %s458_s7 = sphi %s490_s7, %s616_s7   ;;  %s454_s6 = sphi %s488_s6, %s615_s6  }
   0x7   : > { %s29_s14 = sadd.s32 1, %s470_s10  ;;  %s38_s15 = sadd.s32 1, %s462_s8 }
   0x8   : > { %p31_p0 = scmp.ge.s32.totalorder %s29_s14, 2  ;;  %p45_p1 = scmp.ne.s32.totalorder %s462_s8, %s458_s7 }
   0x9   : > { %p46_p2 = scmp.eq.s32.totalorder %s474_s11, 0  ;;  %p51_p3 = scmp.ne.s32.totalorder %s458_s7, %s454_s6 }
   0xa   : > { %s621_s14 = smov (%p31_p0, %s29_s14), 0  ;;  %p52_p5 = scmp.eq.s32.totalorder %s281_s12, 0 }
   0xb   : > { %p529_p4 = por %p46_p2, %p45_p1  ;;  %s33_s17 = ssub.s32 %s470_s10, %s621_s14 }
   0xc   : > { %p77_p6 = scmp.eq.s32.totalorder %s281_s12, 1  ;;  %p36_p7 = scmp.eq.s32.totalorder %s33_s17, 0 }
   0xd   : > { %p535_p8 = por %p52_p5, %p51_p3  ;;  %p83_p10 = scmp.eq.s32.totalorder %s282_s13, 1 }
   0xe   : > { %p539_p9 = por %p77_p6, %p45_p1  ;;  %p284_p12 = scmp.ge.s32.totalorder %s474_s11, 2 }
   0xf   : > { %s544_s20 = scalar_select %p36_p7, %s462_s8, %s38_s15  }
  0x10   : > { %p546_p11 = por %p83_p10, %p51_p3  ;;  %p308_p13 = scmp.lt.s32.totalorder %s474_s11, 2 }
  0x11   : > { %s103_s22 = sand.u32 1, %s462_s8   ;;  %s294_s24 = smul.u32 6, %s470_s10 }
  0x12   : > { %s293_s23 = smul.u32 6, %s103_s22  ;;  %p301_p0 = pnand %p308_p13, %p529_p4 }
  0x13   : > { %s113_s27 = scalar_lea.hbm %s609_s0, %s294_s24  ;;  %p285_p1 = scmp.ge.s32.totalorder %s474_s11, 1 }
  0x14   : > { %s107_s28 = scalar_lea.vmem [#allocation2], %s293_s23  ;;  %s114_s30 = sshll.u32 %s113_s27, 4  ;;  %s115_s30 = int_to_ptr.hbm [resolvable:$true] %s114_s30 }
  0x15   : > { %s116_s29 = sshll.u32 %s107_s28, 4  ;;  %s104_s2 = scalar_lea.sflag [#allocation3], %s103_s22  ;;  %s117_s29 = int_to_ptr.vmem [resolvable:$true] %s116_s29 }
  0x16   : > { %s476_s3 = smov 32   ;;  %s477_s4 = smov 2  }
  0x17   : > { %303 = dma.hbm_to_vmem [thread:$0]  (!%p301_p0), %s115_s30, 96, %s117_s29, %s104_s2, %s476_s3, %s476_s3, %s477_s4  }
  0x18   : > { %p124_p2 = scmp.lt.s32.totalorder %s474_s11, 3 }
  0x1a   : > { %p125_p3 = pnand %p285_p1, %p124_p2 }
  0x1b   : > { %s562_s5 = sand.u32 (!%p125_p3), 1, %s458_s7  }
  0x1c   : > { %128 = sbr.rel (%p125_p3) target bundleno = 67 (0x43), region = 24  ;;  %s131_s13 = scalar_lea.sflag (!%p125_p3), [#allocation3], %s562_s5 }
  0x1d   : > { %s295_s12 = smul.u32 (!%p125_p3), 6, %s562_s5 }
  0x1f   : > { %s134_s15 = scalar_lea.vmem (!%p125_p3), [#allocation2], %s295_s12 }
  0x21   : > { %445 = dma.done.wait (%p535_p8), %s131_s13, 96  }
  0x22   : > { %447 = vsyncadd (%p535_p8), %s131_s13, 4294967200  ;;  %v154_v0 = vld [vmem:[%s134_s15] sm:$0x3]  ;;  %v287_v1 = vld [vmem:[%s134_s15 + $0x2] sm:$0x3]  ;;  %s286_s16 = sshll.u32 %s562_s5, 1  ;;  %v176_v13 = vlaneseq }
  0x23   : > { %v288_v2 = vld [vmem:[%s134_s15 + $0x4] sm:$0x3]  ;;  %v157_v3 = vmax.f32 %v154_v0, %v287_v1  ;;  %s290_s17 = sshll.u32 %s466_s9, 1  ;;  %s153_s24 = scalar_lea.vmem [#allocation5], %s286_s16 }
  0x24   : > { %s194_s23 = scalar_lea.hbm %s610_s1, %s290_s17  ;;  %s196_s25 = sshll.u32 %s153_s24, 4  ;;  %vm178_vm2 = vcmp.lt.s32.totalorder %v176_v13, 256  ;;  %s197_s25 = int_to_ptr.vmem [resolvable:$true] %s196_s25 }
  0x25   : > { %v160_v4 = vmax.f32 %v157_v3, %v288_v2  ;;  %s198_s26 = sshll.u32 %s194_s23, 4  ;;  %s182_s9 = scalar_lea.sflag [#allocation4], %s562_s5  ;;  %s199_s26 = int_to_ptr.hbm [resolvable:$true] %s198_s26 }
  0x26   : > { %s406_s27 = sshra.s32 %s199_s26, 4  ;;  %s412_s2 = scalar_lea.hbm %s610_s1, 4  ;;  %s407_s27 = int_to_ptr.hbm [resolvable:$true] %s406_s27 }
  0x27   : > { %v161_v5 = vsub.f32 1.0, %v160_v4  ;;  %s408_s28 = scalar_lea.hbm %s407_s27, 2  ;;  %p413_p7 = scmp.lt.s32.totalorder %s407_s27, %s610_s1 }
  0x28   : > { %p409_p4 = scmp.ne.s32.totalorder %s407_s27, %s408_s28  ;;  %p414_p8 = scmp.lt.s32.totalorder %s412_s2, %s408_s28 }
  0x29   : > { %360 = vrsqrt.f32 %v161_v5  ;;  %vm170_vm0 = vcmp.eq.f32.partialorder %v161_v5, inf  ;;  %v173_v12 = vand.u32 2147483648, %v161_v5  ;;  %v162_v14 = vmul.f32 %v161_v5, %v161_v5 }
  0x2a   : > { %vm172_vm1 = vcmp.eq.f32.partialorder %v161_v5, 0.0  ;;  %p410_p5 = pnand %p409_p4, %p539_p9  ;;  %p415_p10 = por %p414_p8, %p413_p7 }
  0x2c   : > { %p411_p6 = pneg %p410_p5 }
  0x2e   : > { %p416_p13 = pnand %p415_p10, %p411_p6 }
  0x2f   : > { %v361_v6 = vpop.eup %360 }
  0x30   : > { %v164_v7 = vmul.f32 %v361_v6, %v161_v5 }
  0x32   : > { %v165_v8 = vmul.f32 %v361_v6, %v164_v7 }
  0x34   : > { %v166_v9 = vmul.f32 0.5, %v165_v8 }
  0x36   : > { %v167_v10 = vsub.f32 1.5, %v166_v9 }
  0x38   : > { %v168_v11 = vmul.f32 %v361_v6, %v167_v10 }
  0x3a   : > { %v169_v15 = vmul.f32 %v168_v11, %v161_v5 }
  0x3c   : > { %v171_v16 = vsel %vm170_vm0, %v161_v5, %v169_v15 }
  0x3d   : > { %v174_v17 = vsel %vm172_vm1, %v173_v12, %v171_v16 }
  0x3e   : > { %v175_v18 = vmul.f32 %v174_v17, %v162_v14 }
  0x40   : > { %180 = vst.msk [vmem:[%s153_s24] sm:$0x3] %vm178_vm2, %v175_v18 }
  0x41   : > { %419 = shalt.err (!%p416_p13)
}
  0x42   : > { %298 = dma.vmem_to_hbm [thread:$0]  (%p539_p9), %s197_s25, 32, %s199_s26, %s182_s9  }
  0x43 PF: > { %s210_s5 = sand.u32 1, %s454_s6   ;;  %p305_p0 = pnand %p284_p12, %p546_p11 }
  0x44   : > { %s211_s12 = scalar_lea.sflag [#allocation4], %s210_s5 }
  0x45   : > { %p306_p1 = pneg %p305_p0 }
  0x47   : > { %449 = dma.done.wait (%p306_p1), %s211_s12, 32  }
  0x48   : > { %451 = vsyncadd (%p306_p1), %s211_s12, 4294967264  ;;  %s17_s11 = sadd.s32 1, %s474_s11   ;;  %s615_s6 = smov %s458_s7 }
  0x49   : > { %p14_p2 = scmp.ge.s32.totalorder %s17_s11, 4   ;;  %s616_s7 = smov %s462_s8 }
  0x4a   : > { %s617_s8 = smov %s544_s20  ;;  %s618_s9 = smov %s470_s10 }
  0x4b   : > { %s619_s10 = smov %s621_s14  ;;  %16 = sbr.rel (!%p14_p2) target bundleno = 6 (0x6), region = 71 }
  0x50   :  { %217 = vsyncpa [#allocation3], 1 }
  0x51   :  { %219 = vsyncpa [#allocation3 + $0x1], 1 }
  0x52   :  { %220 = vsyncpa [#allocation4], 1 }
  0x53   :  { %222 = vsyncpa [#allocation4 + $0x1], 1 }

</bundles_post_ra>
